<compile_context>
chip_gen: v7x
topology: tpu7x:2x2x1
jax: 0.10.0
libtpu: 0.0.40
codegen_flags: <defaults>
</compile_context>

<pallas_src>
import jax
import jax.numpy as jnp
from jax.experimental import pallas as pl
from jax.experimental.pallas import tpu as pltpu  # noqa: F401  (available for CompilerParams if tiled later)


_NEG = -1e30  # fill for padded logit lanes: far below any real logit, exp() underflows to 0


def mlp_kernel(x_ref, w1_ref, gamma_ref, beta_ref, w2_ref, b2_ref, out_ref):
    """Fused Linear -> BatchNorm1d(train) -> Linear -> log_softmax.

    Exact algebra (no approximation):
      * b1 is omitted: BN's mean subtraction cancels any per-column bias.
      * logits = (h * s) @ W2 + [ b2 + (beta - mean * s) @ W2 ]
        with s = gamma * rsqrt(var + eps), mean/var = biased batch stats of h.
      * mean / E[h^2] are computed with (1/N)-ones matvecs on the MXU.
    """
    f32 = jnp.float32
    n = x_ref.shape[0]

    # ---- Linear 1 (bias folded away by BN) ----
    h = jnp.dot(x_ref[...], w1_ref[...], preferred_element_type=f32)      # [N, D] f32

    # ---- BatchNorm1d batch statistics (biased), one pass, on the MXU ----
    ones_over_n = jnp.full((1, n), 1.0 / n, dtype=f32)                    # [1, N]
    mean = jnp.dot(ones_over_n, h, preferred_element_type=f32)            # [1, D]
    ex2 = jnp.dot(ones_over_n, h * h, preferred_element_type=f32)         # [1, D]
    var = ex2 - mean * mean                                               # biased variance
    inv_std = jax.lax.rsqrt(var + 1e-5)
    s = inv_std * gamma_ref[...].astype(f32)                              # [1, D]

    # ---- Linear 2 with the BN affine folded into a [1, Cp] bias ----
    w2 = w2_ref[...]
    hs = (h * s).astype(w2.dtype)                                         # [N, D] (only [N,D] VPU op)
    fold = (beta_ref[...].astype(f32) - mean * s).astype(w2.dtype)        # [1, D]
    bias = b2_ref[...] + jnp.dot(fold, w2, preferred_element_type=f32)    # [1, Cp]
    logits = jnp.dot(hs, w2, preferred_element_type=f32) + bias           # [N, Cp]

    # ---- log_softmax over lanes (padded lanes hold _NEG -> exp == 0) ----
    m = jnp.max(logits, axis=1, keepdims=True)
    shifted = logits - m
    lse = jnp.log(jnp.sum(jnp.exp(shifted), axis=1, keepdims=True))
    out_ref[...] = (shifted - lse).astype(out_ref.dtype)


def mlp_forward(x, w1, b1, gamma, beta, w2, b2, *, use_bf16_matmul=False):
    """Forward pass matching the PyTorch MLP (train-mode BatchNorm1d)."""
    del b1  # exact no-op under train-mode BatchNorm (mean subtraction cancels it)

    N, F = x.shape
    D = w1.shape[1]
    C = w2.shape[1]
    Cp = 128 * pl.cdiv(C, 128)  # lane-dense padded output width

    # Pad W2 / b2 so the kernel's output (and all softmax math) is lane-dense.
    w2_p = jnp.pad(w2, ((0, 0), (0, Cp - C)))                                   # zeros in padded cols
    b2_p = jnp.pad(b2.reshape(1, C).astype(jnp.float32),
                   ((0, 0), (0, Cp - C)), constant_values=_NEG)                 # padded logits -> _NEG

    gamma_2d = gamma.reshape(1, D).astype(jnp.float32)
    beta_2d = beta.reshape(1, D).astype(jnp.float32)

    if use_bf16_matmul:
        # bf16 MXU operands (f32 accumulation inside the kernel); BN / softmax stay f32.
        x = x.astype(jnp.bfloat16)
        w1 = w1.astype(jnp.bfloat16)
        w2_p = w2_p.astype(jnp.bfloat16)

    full = lambda shape: pl.BlockSpec(shape, lambda: tuple(0 for _ in shape))

    out_p = pl.pallas_call(
        mlp_kernel,
        out_shape=jax.ShapeDtypeStruct((N, Cp), jnp.float32),
        grid=(),  # BatchNorm needs full-batch stats; whole (small) problem is one block
        in_specs=[
            full((N, F)),
            full((F, D)),
            full((1, D)),
            full((1, D)),
            full((D, Cp)),
            full((1, Cp)),
        ],
        out_specs=full((N, Cp)),
    )(x, w1, gamma_2d, beta_2d, w2_p, b2_p)

    # TODO(synk): for graph-scale N, switch to a 2-pass tiled kernel (pass 1 accumulates
    # per-column sum / sum-of-squares over an N-grid marked "arbitrary"; pass 2 normalizes,
    # applies matmul2 + log_softmax with the N axis "parallel"), with tile sizes budgeted
    # against v7x's 64 MiB VMEM rather than v5e/v6e's 128 MiB.

    return out_p[:, :C]  # drop the padded lanes


if __name__ == "__main__":
    # Small shapes implied by the module: N nodes, num_features, hidden dim, num_classes.
    N, F, D, C = 64, 16, 32, 8

    key = jax.random.PRNGKey(0)
    kx, kw1, kb1, kw2, kb2, kg, kbt = jax.random.split(key, 7)

    x = jax.random.normal(kx, (N, F), dtype=jnp.float32)

    # Deterministic parameter init (PyTorch-like uniform bounds), stored as [in, out].
    lim1 = 1.0 / jnp.sqrt(F)
    w1 = jax.random.uniform(kw1, (F, D), minval=-lim1, maxval=lim1, dtype=jnp.float32)
    b1 = jax.random.uniform(kb1, (D,), minval=-lim1, maxval=lim1, dtype=jnp.float32)

    lim2 = 1.0 / jnp.sqrt(D)
    w2 = jax.random.uniform(kw2, (D, C), minval=-lim2, maxval=lim2, dtype=jnp.float32)
    b2 = jax.random.uniform(kb2, (C,), minval=-lim2, maxval=lim2, dtype=jnp.float32)

    # Non-trivial BatchNorm1d affine params to exercise the folded-affine path.
    gamma = jax.random.uniform(kg, (D,), minval=0.5, maxval=1.5, dtype=jnp.float32)
    beta = 0.1 * jax.random.normal(kbt, (D,), dtype=jnp.float32)

    out = mlp_forward(x, w1, b1, gamma, beta, w2, b2)
    out = jax.block_until_ready(out)

    # Pure-JAX reference (includes b1 — it must cancel exactly under BN).
    h_ref = x @ w1 + b1
    mu = h_ref.mean(axis=0, keepdims=True)
    var = ((h_ref - mu) ** 2).mean(axis=0, keepdims=True)
    h_ref = (h_ref - mu) * jax.lax.rsqrt(var + 1e-5) * gamma + beta
    logits_ref = h_ref @ w2 + b2
    ref = jax.nn.log_softmax(logits_ref, axis=1)

    assert out.shape == (N, C), f"bad output shape {out.shape}"
    assert jnp.allclose(out, ref, atol=1e-4, rtol=1e-4), "mismatch vs reference"

    print("KERNEL_OK")
</pallas_src>

<mosaic_0001>
module attributes {stable_mosaic.version = 11 : i64} {
  func.func @mlp_kernel(%arg0: memref<64x16xf32, #tpu.memory_space<vmem>>, %arg1: memref<16x32xf32, #tpu.memory_space<vmem>>, %arg2: memref<1x32xf32, #tpu.memory_space<vmem>>, %arg3: memref<1x32xf32, #tpu.memory_space<vmem>>, %arg4: memref<32x128xf32, #tpu.memory_space<vmem>>, %arg5: memref<1x128xf32, #tpu.memory_space<vmem>>, %arg6: memref<64x128xf32, #tpu.memory_space<vmem>>) attributes {dimension_semantics = [], scalar_prefetch = 0 : i64, scratch_operands = 0 : i64, tpu.core_type = #tpu.core_type<tc>} {
    %c0 = arith.constant 0 : index
    %c0_0 = arith.constant 0 : index
    %0 = vector.load %arg0[%c0, %c0_0] : memref<64x16xf32, #tpu.memory_space<vmem>>, vector<64x16xf32>
    %c0_1 = arith.constant 0 : index
    %c0_2 = arith.constant 0 : index
    %1 = vector.load %arg1[%c0_1, %c0_2] : memref<16x32xf32, #tpu.memory_space<vmem>>, vector<16x32xf32>
    %cst = arith.constant dense<0.000000e+00> : vector<64x32xf32>
    %2 = tpu.matmul %0, %1, %cst {dimension_numbers = #tpu.dot_dimension_numbers<[1], [0], [0], [1], [0, 0, 1, 1], [], []>} : vector<64x16xf32>, vector<16x32xf32>, vector<64x32xf32> -> vector<64x32xf32>
    %cst_3 = arith.constant 1.562500e-02 : f32
    %3 = vector.broadcast %cst_3 : f32 to vector<1x64xf32>
    %cst_4 = arith.constant dense<0.000000e+00> : vector<1x32xf32>
    %4 = tpu.matmul %3, %2, %cst_4 {dimension_numbers = #tpu.dot_dimension_numbers<[1], [0], [0], [1], [0, 0, 1, 1], [], []>} : vector<1x64xf32>, vector<64x32xf32>, vector<1x32xf32> -> vector<1x32xf32>
    %5 = arith.mulf %2, %2 : vector<64x32xf32>
    %cst_5 = arith.constant dense<0.000000e+00> : vector<1x32xf32>
    %6 = tpu.matmul %3, %5, %cst_5 {dimension_numbers = #tpu.dot_dimension_numbers<[1], [0], [0], [1], [0, 0, 1, 1], [], []>} : vector<1x64xf32>, vector<64x32xf32>, vector<1x32xf32> -> vector<1x32xf32>
    %7 = arith.mulf %4, %4 : vector<1x32xf32>
    %8 = arith.subf %6, %7 : vector<1x32xf32>
    %cst_6 = arith.constant 9.99999974E-6 : f32
    %9 = vector.broadcast %cst_6 : f32 to vector<1x32xf32>
    %10 = arith.addf %8, %9 : vector<1x32xf32>
    %11 = math.rsqrt %10 : vector<1x32xf32>
    %c0_7 = arith.constant 0 : index
    %c0_8 = arith.constant 0 : index
    %12 = vector.load %arg2[%c0_7, %c0_8] : memref<1x32xf32, #tpu.memory_space<vmem>>, vector<1x32xf32>
    %13 = arith.mulf %11, %12 : vector<1x32xf32>
    %c0_9 = arith.constant 0 : index
    %c0_10 = arith.constant 0 : index
    %14 = vector.load %arg4[%c0_9, %c0_10] : memref<32x128xf32, #tpu.memory_space<vmem>>, vector<32x128xf32>
    %15 = vector.broadcast %13 : vector<1x32xf32> to vector<64x32xf32>
    %16 = arith.mulf %2, %15 : vector<64x32xf32>
    %c0_11 = arith.constant 0 : index
    %c0_12 = arith.constant 0 : index
    %17 = vector.load %arg3[%c0_11, %c0_12] : memref<1x32xf32, #tpu.memory_space<vmem>>, vector<1x32xf32>
    %18 = arith.mulf %4, %13 : vector<1x32xf32>
    %19 = arith.subf %17, %18 : vector<1x32xf32>
    %c0_13 = arith.constant 0 : index
    %c0_14 = arith.constant 0 : index
    %20 = vector.load %arg5[%c0_13, %c0_14] : memref<1x128xf32, #tpu.memory_space<vmem>>, vector<1x128xf32>
    %cst_15 = arith.constant dense<0.000000e+00> : vector<1x128xf32>
    %21 = tpu.matmul %19, %14, %cst_15 {dimension_numbers = #tpu.dot_dimension_numbers<[1], [0], [0], [1], [0, 0, 1, 1], [], []>} : vector<1x32xf32>, vector<32x128xf32>, vector<1x128xf32> -> vector<1x128xf32>
    %22 = arith.addf %20, %21 : vector<1x128xf32>
    %cst_16 = arith.constant dense<0.000000e+00> : vector<64x128xf32>
    %23 = tpu.matmul %16, %14, %cst_16 {dimension_numbers = #tpu.dot_dimension_numbers<[1], [0], [0], [1], [0, 0, 1, 1], [], []>} : vector<64x32xf32>, vector<32x128xf32>, vector<64x128xf32> -> vector<64x128xf32>
    %24 = vector.broadcast %22 : vector<1x128xf32> to vector<64x128xf32>
    %25 = arith.addf %23, %24 : vector<64x128xf32>
    %cst_17 = arith.constant dense<0xFF800000> : vector<64xf32>
    %26 = vector.multi_reduction <maximumf>, %25, %cst_17 [1] : vector<64x128xf32> to vector<64xf32>
    %27 = vector.shape_cast %26 : vector<64xf32> to vector<64x1xf32>
    %28 = vector.broadcast %27 : vector<64x1xf32> to vector<64x128xf32>
    %29 = arith.subf %25, %28 : vector<64x128xf32>
    %30 = math.exp %29 : vector<64x128xf32>
    %cst_18 = arith.constant dense<0.000000e+00> : vector<64xf32>
    %31 = vector.multi_reduction <add>, %30, %cst_18 [1] : vector<64x128xf32> to vector<64xf32>
    %32 = vector.shape_cast %31 : vector<64xf32> to vector<64x1xf32>
    %33 = math.log %32 : vector<64x1xf32>
    %34 = vector.broadcast %33 : vector<64x1xf32> to vector<64x128xf32>
    %35 = arith.subf %29, %34 : vector<64x128xf32>
    %c0_19 = arith.constant 0 : index
    %c0_20 = arith.constant 0 : index
    %36 = vector.load %arg6[%c0_19, %c0_20] : memref<64x128xf32, #tpu.memory_space<vmem>>, vector<64x128xf32>
    tpu.vector_store %arg6[%c0_19, %c0_20], %35 {strides = array<i32>} : memref<64x128xf32, #tpu.memory_space<vmem>>, vector<64x128xf32>,
    return
  }
}

</mosaic_0001>

<bundles_post_ra>
// kernel: tpu_custom_call.1
= control target key start
LH: loop header
LB: loop body
LE: loop exit
PB: predicated region body
PF: predicated region fallthrough
CT: control target
= control target key end

     0   :  { %vm34_vm0 = vcmask 130048   ;;  %s1099_s0 = inlined_call_operand.vmem [shape: f32[64,16], index: 0, kind: input, shape index: {}]   ;;  %s1100_s1 = inlined_call_operand.vmem [shape: f32[16,32], index: 1, kind: input, shape index: {}]   ;;  %s1101_s2 = inlined_call_operand.vmem [shape: f32[1,32], index: 2, kind: input, shape index: {}]   ;;  %s1102_s3 = inlined_call_operand.vmem [shape: f32[1,32], index: 3, kind: input, shape index: {}]   ;;  %s1103_s4 = inlined_call_operand.vmem [shape: f32[32,128], index: 4, kind: input, shape index: {}]   ;;  %s1104_s5 = inlined_call_operand.vmem [shape: f32[1,128], index: 5, kind: input, shape index: {}]   ;;  %s1105_s6 = inlined_call_operand.hbm [shape: f32[64,128], index: 6, kind: output, shape index: {}]  }
   0x1   :  { %v32_v0 = vld [vmem:[%s1100_s1] sm:$0xff]  ;;  %v33_v1 = vld [vmem:[%s1100_s1 + $0x8] sm:$0xff] }
   0x2   :  { %v24_v2 = vld [vmem:[%s1099_s0] sm:$0xff]  ;;  %v805_v3 = vpack.c.bf16 %v33_v1, %v32_v0 }
   0x3   :  { %724 = vmatprep.mubr.msk.f32.mxu1 %vm34_vm0, %v24_v2 }
   0x4   :  { %806 = vmatprep.subr.bf16.mxu1 %v805_v3 }
   0x5   :  { %11 = vsyncpa [#allocation3], 0  ;;  %808 = vmatpush3.bf16.msra.mxu1 %v805_v3  ;;  %v25_v4 = vld [vmem:[%s1099_s0 + $0x8] sm:$0xff]  ;;  %v26_v5 = vld [vmem:[%s1099_s0 + $0x10] sm:$0xff]  ;;  %v912_v11 = vmov 0.0|0.0   ;;  %vm913_vm1 = vmmov 0   ;;  %v326_v51 = vlaneseq }
   0x6   :  { %v27_v6 = vld [vmem:[%s1099_s0 + $0x18] sm:$0xff]  ;;  %v28_v7 = vld [vmem:[%s1099_s0 + $0x20] sm:$0xff]  ;;  %v29_v8 = vld [vmem:[%s1099_s0 + $0x28] sm:$0xff]  ;;  %809 = vmatprep.subr.bf16.mxu1 %v912_v11  ;;  %821 = vmatprep.subr.bf16.mxu0 %v912_v11  ;;  %v914_v12 = vmov 0.0   ;;  %vm164_vm2 = vcmask 523264   ;;  %v915_v37 = vmov 0.015625  }
   0x7   :  { %v30_v9 = vld [vmem:[%s1099_s0 + $0x30] sm:$0xff]  ;;  %v31_v10 = vld [vmem:[%s1099_s0 + $0x38] sm:$0xff]  ;;  %771 = vmatprep.mubr.msk.f32.mxu0 %vm913_vm1, %v914_v12  ;;  %v322_v38 = vld [vmem:[%s1103_s4] sm:$0xff]  ;;  %v327_v52 = vshrl.u32 %v326_v51, 7  ;;  %vm342_vm3 = vcmask 261120  }
   0x8   :  { %725 = vmatmul.mubr.msk.f32.vlgmr.msra.gmra.mrb[0].mxu1 %vm34_vm0, %v25_v4  ;;  %v323_v39 = vld [vmem:[%s1103_s4 + $0x8] sm:$0xff]  ;;  %v324_v41 = vld [vmem:[%s1103_s4 + $0x10] sm:$0xff]  ;;  %v325_v42 = vld [vmem:[%s1103_s4 + $0x18] sm:$0xff] }
   0x9   :  { %727 = vmatprep.mubr.msk.f32.mxu1 %vm34_vm0, %v26_v5  ;;  %v834_v40 = vpack.c.bf16 %v323_v39, %v322_v38  ;;  %v837_v43 = vpack.c.bf16 %v325_v42, %v324_v41  ;;  %v320_v53 = vld [vmem:[%s1101_s2] sm:$0x1]  ;;  %v328_v54 = vsub.s32 0, %v327_v52 }
   0xa   :  { %v338_v57 = vld [vmem:[%s1102_s3] sm:$0x1] }
   0xb   :  { %v341_v5 = vld [vmem:[%s1104_s5] sm:$0x1]  ;;  %s916_s5 = smov [#allocation2]  }
   0xc   :  { %728 = vmatmul.mubr.msk.f32.gmra.mrb[2].mxu1 %vm34_vm0, %v27_v6  ;;  %s645_s26 = sshll.u32 %s916_s5, 4  ;;  %s646_s26 = int_to_ptr.vmem [resolvable:$true] %s645_s26 }
   0xd   :  { %730 = vmatprep.mubr.msk.f32.mxu1 %vm34_vm0, %v28_v7  ;;  %s888_s27 = scalar_lea.vmem %s646_s26, 1024  ;;  %p893_p1 = scmp.lt.s32.totalorder %s646_s26, %s646_s26 }
   0xe   :  { %p889_p0 = scmp.ne.s32.totalorder %s646_s26, %s888_s27  ;;  %p894_p2 = scmp.lt.s32.totalorder %s888_s27, %s888_s27 }
  0x10   :  { %731 = vmatmul.mubr.msk.f32.gmra.mrb[4].mxu1 %vm34_vm0, %v29_v8  ;;  %p895_p3 = por %p894_p2, %p893_p1 }
  0x11   :  { %733 = vmatprep.mubr.msk.f32.mxu1 %vm34_vm0, %v30_v9 }
  0x12   :  { %p896_p4 = pnand %p895_p3, %p889_p0 }
  0x14   :  { %734 = vmatmul.mubr.msk.f32.gmra.mrb[6].mxu1 %vm34_vm0, %v31_v10 }
  0x15   :  { %752 = vmatprep.mubr.msk.f32.mxu1 %vm913_vm1, %v914_v12 }
  0xdb   :  { %v994_v13 = vpop.f32.mrb[0].mxu1 }
  0xdc   :  { %v996_v14 = vpop.f32.mrb[1].mxu1  ;;  %v239_v15 = vmul.f32 %v994_v13, %v994_v13 }
  0xdd   :  { %v810_v16 = vpack.c.bf16 %v994_v13, %v996_v14  ;;  %v238_v17 = vmul.f32 %v996_v14, %v996_v14 }
  0xdf   :  { %v1004_v18 = vpop.f32.mrb[2].mxu1  ;;  %811 = vmatpush3.bf16.msra.mxu1 %v810_v16  ;;  %v822_v19 = vpack.c.bf16 %v239_v15, %v238_v17 }
  0xe0   :  { %v241_v20 = vmul.f32 %v1004_v18, %v1004_v18  ;;  %v1008_v21 = vpop.f32.mrb[3].mxu1  ;;  %812 = vmatprep.subr.bf16.mxu1 %v912_v11 }
  0xe1   :  { %v813_v22 = vpack.c.bf16 %v1004_v18, %v1008_v21  ;;  %v240_v23 = vmul.f32 %v1008_v21, %v1008_v21  ;;  %823 = vmatpush3.bf16.msra.mxu0 %v822_v19 }
  0xe2   :  { %824 = vmatprep.subr.bf16.mxu0 %v912_v11 }
  0xe3   :  { %v1014_v24 = vpop.f32.mrb[4].mxu1  ;;  %814 = vmatpush3.bf16.msra.mxu1 %v813_v22  ;;  %v825_v25 = vpack.c.bf16 %v241_v20, %v240_v23 }
  0xe4   :  { %v243_v26 = vmul.f32 %v1014_v24, %v1014_v24  ;;  %v145_v27 = vpop.f32.mrb[5].mxu1  ;;  %815 = vmatprep.subr.bf16.mxu1 %v912_v11 }
  0xe5   :  { %v816_v28 = vpack.c.bf16 %v1014_v24, %v145_v27  ;;  %v242_v29 = vmul.f32 %v145_v27, %v145_v27  ;;  %826 = vmatpush3.bf16.msra.mxu0 %v825_v25 }
  0xe6   :  { %827 = vmatprep.subr.bf16.mxu0 %v912_v11 }
  0xe7   :  { %v735_v30 = vpop.f32.mrb[6].mxu1  ;;  %817 = vmatpush3.bf16.msra.mxu1 %v816_v28  ;;  %v828_v31 = vpack.c.bf16 %v243_v26, %v242_v29 }
  0xe8   :  { %v245_v32 = vmul.f32 %v735_v30, %v735_v30  ;;  %v155_v33 = vpop.f32.mrb[7].mxu1  ;;  %818 = vmatprep.subr.bf16.mxu1 %v912_v11 }
  0xe9   :  { %v819_v34 = vpack.c.bf16 %v735_v30, %v155_v33  ;;  %v244_v35 = vmul.f32 %v155_v33, %v155_v33  ;;  %829 = vmatpush3.bf16.msra.mxu0 %v828_v31 }
  0xea   :  { %830 = vmatprep.subr.bf16.mxu0 %v912_v11 }
  0xeb   :  { %820 = vmatpush3.bf16.msra.mxu1 %v819_v34  ;;  %v831_v36 = vpack.c.bf16 %v245_v32, %v244_v35 }
  0xec   :  { %833 = vmatprep.subr.bf16.mxu1 %v912_v11 }
  0xed   :  { %832 = vmatpush3.bf16.msra.mxu0 %v831_v36 }
  0xee   :  { %753 = vmatmul.mubr.msk.f32.vlgmr.msra.gmra.mrb[8].mxu1 %vm164_vm2, %v915_v37  ;;  %840 = vmatprep.subr.bf16.mxu0 %v834_v40 }
  0xef   :  { %782 = vmatprep.mubr.msk.f32.mxu1 %vm913_vm1, %v914_v12  ;;  %835 = vmatpush3.bf16.msra.mxu1 %v834_v40 }
  0xf0   :  { %772 = vmatmul.mubr.msk.f32.vlgmr.msra.gmra.mrb[0].mxu0 %vm164_vm2, %v915_v37  ;;  %836 = vmatprep.subr.bf16.mxu1 %v912_v11 }
  0xf1   :  { %842 = vmatpush3.bf16.msra.mxu0 %v834_v40 }
  0xf2   :  { %844 = vmatprep.subr.bf16.mxu0 %v837_v43 }
  0xf3   :  { %838 = vmatpush3.bf16.msra.mxu1 %v837_v43 }
  0xf5   :  { %846 = vmatpush3.bf16.msra.mxu0 %v837_v43 }
 0x1c1   :  { %v234_v44 = vpop.f32.mrb[8].mxu1 }
 0x1c2   :  { %v316_v45 = vmul.f32 %v234_v44, %v234_v44  ;;  %v754_v46 = vpop.f32.mrb[9].mxu1 }
 0x1c3   :  { %v312_v47 = vpop.f32.mrb[0].mxu0 }
 0x1c4   :  { %v317_v48 = vsub.f32 %v312_v47, %v316_v45  ;;  %v773_v49 = vpop.f32.mrb[1].mxu0 }
 0x1c6   :  { %v318_v50 = vadd.f32 1e-05, %v317_v48 }
 0x1c8   :  { %854 = vrsqrt.f32 %v318_v50 }
 0x1d2   :  { %v855_v55 = vpop.eup %854 }
 0x1d3   :  { %v321_v56 = vmul.f32 %v855_v55, %v320_v53 }
 0x1d5   :  { %v329_v58 = vrot.slane %v321_v56, %v328_v54  ;;  %v339_v59 = vmul.f32 %v321_v56, %v234_v44 }
 0x1d7   :  { %v340_v60 = vsub.f32 %v338_v57, %v339_v59  ;;  %v330_v61 = vmul.f32 %v329_v58, %v996_v14  ;;  %v331_v62 = vmul.f32 %v994_v13, %v329_v58  ;;  %v332_v63 = vmul.f32 %v329_v58, %v1008_v21 }
 0x1d8   :  { %v333_v0 = vmul.f32 %v1004_v18, %v329_v58  ;;  %v334_v1 = vmul.f32 %v329_v58, %v145_v27  ;;  %v335_v2 = vmul.f32 %v1014_v24, %v329_v58  ;;  %v336_v3 = vmul.f32 %v329_v58, %v155_v33 }
 0x1d9   :  { %783 = vmatmul.mubr.msk.f32.vlgmr.msra.gmra.mrb[10].mxu1 %vm342_vm3, %v340_v60  ;;  %793 = vmatprep.mubr.msk.f32.mxu0 %vm342_vm3, %v330_v61  ;;  %v337_v4 = vmul.f32 %v735_v30, %v329_v58 }
 0x1da   :  { %794 = vmatmul.mubr.msk.f32.vlgmr.msra.gmra.mrb[2].mxu0 %vm342_vm3, %v331_v62 }
 0x1db   :  { %796 = vmatprep.mubr.msk.f32.mxu0 %vm342_vm3, %v332_v63 }
 0x1de   :  { %797 = vmatmul.mubr.msk.f32.gmra.mrb[4].mxu0 %vm342_vm3, %v333_v0 }
 0x1df   :  { %799 = vmatprep.mubr.msk.f32.mxu0 %vm342_vm3, %v334_v1 }
 0x1e2   :  { %800 = vmatmul.mubr.msk.f32.gmra.mrb[6].mxu0 %vm342_vm3, %v335_v2 }
 0x1e3   :  { %802 = vmatprep.mubr.msk.f32.mxu0 %vm342_vm3, %v336_v3 }
 0x1e6   :  { %803 = vmatmul.mubr.msk.f32.gmra.mrb[8].mxu0 %vm342_vm3, %v337_v4 }
 0x2ac   :  { %v412_v6 = vpop.f32.mrb[10].mxu1 }
 0x2ad   :  { %v416_v7 = vadd.f32 %v412_v6, %v341_v5  ;;  %v784_v8 = vpop.f32.mrb[11].mxu1  ;;  %v795_v9 = vpop.f32.mrb[2].mxu0 }
 0x2ae   :  { %v513_v10 = vpop.f32.mrb[3].mxu0 }
 0x2af   :  { %v421_v11 = vrot.slane %v416_v7, %v328_v54 }
 0x2b1   :  { %v519_v12 = vadd.f32 %v795_v9, %v421_v11  ;;  %v514_v13 = vadd.f32 %v513_v10, %v421_v11  ;;  %v798_v14 = vpop.f32.mrb[4].mxu0 }
 0x2b2   :  { %v529_v15 = vadd.f32 %v798_v14, %v421_v11  ;;  %v523_v16 = vpop.f32.mrb[5].mxu0 }
 0x2b3   :  { %v524_v17 = vadd.f32 %v523_v16, %v421_v11  ;;  %552 = vmax.xlane.f32.xlu0 %v514_v13 }
 0x2b4   :  { %558 = vmax.xlane.f32.xlu1 %v529_v15 }
 0x2b5   :  { %v801_v18 = vpop.f32.mrb[6].mxu0 }
 0x2b6   :  { %v539_v19 = vadd.f32 %v801_v18, %v421_v11  ;;  %v533_v20 = vpop.f32.mrb[7].mxu0 }
 0x2b7   :  { %v534_v21 = vadd.f32 %v533_v20, %v421_v11  ;;  %554 = vmax.xlane.f32.xlu0 %v519_v12 }
 0x2b8   :  { %556 = vmax.xlane.f32.xlu1 %v524_v17 }
 0x2b9   :  { %v804_v22 = vpop.f32.mrb[8].mxu0 }
 0x2ba   :  { %v549_v23 = vadd.f32 %v804_v22, %v421_v11  ;;  %v543_v24 = vpop.f32.mrb[9].mxu0 }
 0x2bb   :  { %v544_v25 = vadd.f32 %v543_v24, %v421_v11  ;;  %560 = vmax.xlane.f32.xlu0 %v534_v21 }
 0x2bc   :  { %562 = vmax.xlane.f32.xlu1 %v539_v19 }
 0x2bf   :  { %564 = vmax.xlane.f32.xlu0 %v544_v25 }
 0x2c0   :  { %566 = vmax.xlane.f32.xlu1 %v549_v23 }
 0x340   :  { %v553_v26 = vpop.xlane.xlu0 %552 }
 0x341   :  { %v1055_v27 = vsub.f32 %v514_v13, %v553_v26  ;;  %v559_v28 = vpop.xlane.xlu1 %558 }
 0x342   :  { %v1058_v30 = vsub.f32 %v529_v15, %v559_v28 }
 0x343   :  { %v576_v29 = vmul.f32 1.442695, %v1055_v27 }
 0x344   :  { %v555_v31 = vpop.xlane.xlu0 %554  ;;  %v582_v36 = vmul.f32 1.442695, %v1058_v30 }
 0x345   :  { %856 = vpow2.f32 %v576_v29  ;;  %v1060_v32 = vsub.f32 %v519_v12, %v555_v31  ;;  %v557_v33 = vpop.xlane.xlu1 %556 }
 0x346   :  { %v1062_v34 = vsub.f32 %v524_v17, %v557_v33 }
 0x347   :  { %v578_v35 = vmul.f32 1.442695, %v1060_v32 }
 0x348   :  { %v580_v37 = vmul.f32 1.442695, %v1062_v34  ;;  %v561_v38 = vpop.xlane.xlu0 %560 }
 0x349   :  { %858 = vpow2.f32 %v578_v35  ;;  %v1067_v39 = vsub.f32 %v534_v21, %v561_v38  ;;  %v563_v40 = vpop.xlane.xlu1 %562 }
 0x34a   :  { %860 = vpow2.f32 %v580_v37  ;;  %v1069_v41 = vsub.f32 %v539_v19, %v563_v40 }
 0x34b   :  { %v584_v42 = vmul.f32 1.442695, %v1067_v39  ;;  %862 = vpow2.f32 %v582_v36 }
 0x34c   :  { %v586_v43 = vmul.f32 1.442695, %v1069_v41  ;;  %v565_v44 = vpop.xlane.xlu0 %564 }
 0x34d   :  { %864 = vpow2.f32 %v584_v42  ;;  %v1073_v45 = vsub.f32 %v544_v25, %v565_v44  ;;  %v567_v46 = vpop.xlane.xlu1 %566 }
 0x34e   :  { %v1075_v47 = vsub.f32 %v549_v23, %v567_v46  ;;  %866 = vpow2.f32 %v586_v43 }
 0x34f   :  { %v857_v48 = vpop.eup %856  ;;  %v588_v49 = vmul.f32 1.442695, %v1073_v45 }
 0x350   :  { %592 = vadd.xlane.f32.xlu0 %v857_v48  ;;  %v590_v50 = vmul.f32 1.442695, %v1075_v47 }
 0x351   :  { %868 = vpow2.f32 %v588_v49 }
 0x352   :  { %870 = vpow2.f32 %v590_v50 }
 0x353   :  { %v859_v51 = vpop.eup %858 }
 0x354   :  { %v861_v52 = vpop.eup %860  ;;  %594 = vadd.xlane.f32.xlu1 %v859_v51 }
 0x355   :  { %596 = vadd.xlane.f32.xlu0 %v861_v52  ;;  %v863_v53 = vpop.eup %862 }
 0x357   :  { %v865_v54 = vpop.eup %864 }
 0x358   :  { %598 = vadd.xlane.f32.xlu1 %v863_v53  ;;  %v867_v55 = vpop.eup %866 }
 0x359   :  { %600 = vadd.xlane.f32.xlu0 %v865_v54 }
 0x35b   :  { %v869_v56 = vpop.eup %868 }
 0x35c   :  { %602 = vadd.xlane.f32.xlu1 %v867_v55  ;;  %v871_v57 = vpop.eup %870 }
 0x35d   :  { %604 = vadd.xlane.f32.xlu0 %v869_v56 }
 0x360   :  { %606 = vadd.xlane.f32.xlu1 %v871_v57 }
 0x3dd   :  { %v593_v58 = vpop.xlane.xlu0 %592 }
 0x3de   :  { %872 = vlog2.f32 %v593_v58 }
 0x3e1   :  { %v595_v59 = vpop.xlane.xlu1 %594 }
 0x3e2   :  { %874 = vlog2.f32 %v595_v59  ;;  %v597_v60 = vpop.xlane.xlu0 %596 }
 0x3e3   :  { %876 = vlog2.f32 %v597_v60 }
 0x3e5   :  { %v599_v61 = vpop.xlane.xlu1 %598 }
 0x3e6   :  { %878 = vlog2.f32 %v599_v61  ;;  %v601_v62 = vpop.xlane.xlu0 %600 }
 0x3e7   :  { %880 = vlog2.f32 %v601_v62 }
 0x3e8   :  { %v873_v63 = vpop.eup %872 }
 0x3e9   :  { %v609_v0 = vmul.f32 0.6931472, %v873_v63  ;;  %v603_v1 = vpop.xlane.xlu1 %602 }
 0x3ea   :  { %882 = vlog2.f32 %v603_v1  ;;  %v605_v2 = vpop.xlane.xlu0 %604 }
 0x3eb   :  { %v624_v3 = vsub.f32 %v1055_v27, %v609_v0  ;;  %884 = vlog2.f32 %v605_v2 }
 0x3ec   :  { %v875_v4 = vpop.eup %874 }
 0x3ed   :  { %v877_v5 = vpop.eup %876  ;;  %632 = vst [vmem:[#allocation2] sm:$0xff] %v624_v3  ;;  %v611_v6 = vmul.f32 0.6931472, %v875_v4  ;;  %v607_v7 = vpop.xlane.xlu1 %606 }
 0x3ee   :  { %v613_v8 = vmul.f32 0.6931472, %v877_v5  ;;  %886 = vlog2.f32 %v607_v7 }
 0x3ef   :  { %v625_v9 = vsub.f32 %v1060_v32, %v611_v6 }
 0x3f0   :  { %v879_v10 = vpop.eup %878  ;;  %v626_v11 = vsub.f32 %v1062_v34, %v613_v8 }
 0x3f1   :  { %v881_v12 = vpop.eup %880  ;;  %633 = vst [vmem:[#allocation2 + $0x8] sm:$0xff] %v625_v9  ;;  %v615_v13 = vmul.f32 0.6931472, %v879_v10 }
 0x3f2   :  { %634 = vst [vmem:[#allocation2 + $0x10] sm:$0xff] %v626_v11  ;;  %v617_v14 = vmul.f32 0.6931472, %v881_v12 }
 0x3f3   :  { %v627_v15 = vsub.f32 %v1058_v30, %v615_v13 }
 0x3f4   :  { %v883_v16 = vpop.eup %882  ;;  %v628_v17 = vsub.f32 %v1067_v39, %v617_v14 }
 0x3f5   :  { %v885_v18 = vpop.eup %884  ;;  %635 = vst [vmem:[#allocation2 + $0x18] sm:$0xff] %v627_v15  ;;  %v619_v19 = vmul.f32 0.6931472, %v883_v16 }
 0x3f6   :  { %636 = vst [vmem:[#allocation2 + $0x20] sm:$0xff] %v628_v17  ;;  %v621_v20 = vmul.f32 0.6931472, %v885_v18 }
 0x3f7   :  { %v629_v21 = vsub.f32 %v1069_v41, %v619_v19 }
 0x3f8   :  { %v887_v22 = vpop.eup %886  ;;  %v630_v23 = vsub.f32 %v1073_v45, %v621_v20 }
 0x3f9   :  { %637 = vst [vmem:[#allocation2 + $0x28] sm:$0xff] %v629_v21  ;;  %v623_v24 = vmul.f32 0.6931472, %v887_v22 }
 0x3fa   :  { %638 = vst [vmem:[#allocation2 + $0x30] sm:$0xff] %v630_v23 }
 0x3fb   :  { %v631_v25 = vsub.f32 %v1075_v47, %v623_v24 }
 0x3fd   :  { %639 = vst [vmem:[#allocation2 + $0x38] sm:$0xff] %v631_v25 }
 0x3fe   :  { %899 = shalt.err (!%p896_p4)
}
 0x3ff   :  { %s900_s30 = scalar_lea.hbm %s1105_s6, 1024 }
 0x400   :  { %p901_p5 = scmp.ne.s32.totalorder %s1105_s6, %s900_s30  ;;  %p904_p6 = scmp.lt.u32.totalorder %s900_s30, %s1105_s6 }
 0x402   :  { %p906_p7 = pnand %p904_p6, %p901_p5 }
 0x404   :  { %909 = shalt.err (!%p906_p7)
}
 0x405   :  { %s917_s10 = smov 128   ;;  %s918_s11 = smov 8  }
 0x406   :  { %651 = dma.vmem_to_hbm [thread:$0]  %s646_s26, 1024, %s1105_s6, [#allocation3], %s917_s10, %s917_s10, %s918_s11  }
 0x407   :  { %910 = dma.done.wait [#allocation3], 1024  }
 0x408   :  { %911 = vsyncadd [#allocation3], 4294966272 }
 0x409   :  { %655 = vsyncpa [#allocation3], 1 }

</bundles_post_ra>
